<compile_context>
chip_gen: v5e
topology: v5e:2x2
jax: 0.10.0
libtpu: 0.0.40
codegen_flags: <defaults>
</compile_context>

<pallas_src>
import jax
import jax.numpy as jnp
from jax.experimental import pallas as pl
from jax.experimental.pallas import tpu as pltpu

_LANE = 128
_NEG_SLOPE = 0.2


def _leaky_relu(x, slope=_NEG_SLOPE):
    return jnp.where(x > 0, x, slope * x)


def _round_up(n, m):
    return ((n + m - 1) // m) * m


def generator_kernel(x_ref,
                     w1_ref, b1_ref,
                     w2_ref, b2_ref,
                     w3_ref, b3_ref,
                     w4_ref, b4_ref,
                     o_ref):
    # Hoist weight/bias loads once per grid step (avoids re-materializing
    # broadcasts of the (1, N) biases per dot).
    x = x_ref[...]
    w1, b1 = w1_ref[...], b1_ref[...]
    w2, b2 = w2_ref[...], b2_ref[...]
    w3, b3 = w3_ref[...], b3_ref[...]
    w4, b4 = w4_ref[...], b4_ref[...]

    # fc1 -> LeakyReLU      (dropout == identity, eval mode)
    h = jnp.dot(x, w1, preferred_element_type=jnp.float32) + b1
    h = _leaky_relu(h)
    # fc2 -> LeakyReLU
    h = jnp.dot(h.astype(w2.dtype), w2, preferred_element_type=jnp.float32) + b2
    h = _leaky_relu(h)
    # fc3 -> LeakyReLU
    h = jnp.dot(h.astype(w3.dtype), w3, preferred_element_type=jnp.float32) + b3
    h = _leaky_relu(h)
    # fc4 -> tanh. Intermediates are lane-padded to a multiple of 128; slice
    # the padding away before the (possibly narrow) output store so the HBM
    # writeback only carries out_features lanes per row.
    h = jnp.dot(h.astype(w4.dtype), w4, preferred_element_type=jnp.float32) + b4
    nout = o_ref.shape[-1]
    o_ref[...] = jnp.tanh(h[:, :nout]).astype(o_ref.dtype)


def _pad2(a, rows, cols):
    return jnp.pad(a, ((0, rows - a.shape[0]), (0, cols - a.shape[1])))


def prepare_params(params, matmul_dtype=jnp.bfloat16):
    """Zero-pad hidden dims to 128 lanes (exact: leaky_relu(0)=0, zero weight
    rows contribute nothing); cast weights to the matmul dtype, biases f32."""
    in_f = params["w1"].shape[0]
    out_f = params["w4"].shape[1]
    out_p = _round_up(out_f, _LANE)
    prepped = (
        _pad2(params["w1"], in_f, _LANE).astype(matmul_dtype),
        _pad2(params["b1"], 1, _LANE).astype(jnp.float32),
        _pad2(params["w2"], _LANE, _LANE).astype(matmul_dtype),
        _pad2(params["b2"], 1, _LANE).astype(jnp.float32),
        _pad2(params["w3"], _LANE, _LANE).astype(matmul_dtype),
        _pad2(params["b3"], 1, _LANE).astype(jnp.float32),
        _pad2(params["w4"], _LANE, out_p).astype(matmul_dtype),
        _pad2(params["b4"], 1, out_p).astype(jnp.float32),
    )
    return prepped, out_f, out_p


def generator_forward(x, params, *,
                      block_rows=2048,
                      matmul_dtype=jnp.bfloat16,
                      out_dtype=jnp.float32,
                      batch_dim_semantics="parallel"):
    """x: (B, in_features) float32. params: dict of (w1,b1,...,w4,b4).

    batch_dim_semantics: pass pltpu.CORE_PARALLEL on v7x (2 TCs/chip) when the
    grid has >= 2 steps; plain "parallel" is the portable default.
    """
    B, in_f = x.shape
    weights, out_f, out_p = prepare_params(params, matmul_dtype)

    # Sublane granularity: 8 rows for f32, 16 for bf16 (packed).
    sublane = 8 * (4 // jnp.dtype(matmul_dtype).itemsize)
    # Cap tb so the ~6 live (tb,128) f32 intermediates plus the double-buffered
    # x/out tiles stay well under the 32 MiB default scoped VMEM (v7x-safe).
    max_rows = min(block_rows, 4096)
    tb = min(_round_up(B, sublane), _round_up(max_rows, sublane))
    b_pad = _round_up(B, tb)

    x_p = x if b_pad == B else jnp.pad(x, ((0, b_pad - B), (0, 0)))
    x_p = x_p.astype(matmul_dtype)

    grid = (b_pad // tb,)

    in_specs = [pl.BlockSpec((tb, in_f), lambda i: (i, 0))]
    # Weights/biases: constant index_map -> stay resident in VMEM.
    in_specs += [pl.BlockSpec(w.shape, lambda i: (0, 0)) for w in weights]
    # Output keeps its natural (un-padded) feature width in HBM: the masked
    # partial-store cost is hidden under the memory bound, and the writeback
    # DMA only moves out_f columns per row.
    out_spec = pl.BlockSpec((tb, out_f), lambda i: (i, 0))

    flops = 2 * b_pad * (in_f * _LANE + _LANE * _LANE + _LANE * _LANE
                         + _LANE * out_p)
    bytes_accessed = (b_pad * in_f * x_p.dtype.itemsize
                      + b_pad * out_f * jnp.dtype(out_dtype).itemsize
                      + sum(int(w.size) * w.dtype.itemsize for w in weights))
    cost = pl.CostEstimate(flops=flops,
                           transcendentals=b_pad * out_f,
                           bytes_accessed=bytes_accessed)

    out = pl.pallas_call(
        generator_kernel,
        out_shape=jax.ShapeDtypeStruct((b_pad, out_f), out_dtype),
        grid=grid,
        in_specs=in_specs,
        out_specs=out_spec,
        compiler_params=pltpu.CompilerParams(
            dimension_semantics=(batch_dim_semantics,)),
        cost_estimate=cost,
    )(x_p, *weights)

    return out if b_pad == B else out[:B]


def init_params(key, in_features, out_features):
    """Weights stored pre-transposed as (in_dim, out_dim); biases (1, out_dim).
    Mimics PyTorch Linear's U(-1/sqrt(fan_in), 1/sqrt(fan_in)) init."""
    dims = [(in_features, 32), (32, 64), (64, 128), (128, out_features)]
    params = {}
    for i, (fin, fout) in enumerate(dims, start=1):
        key, kw, kb = jax.random.split(key, 3)
        bound = 1.0 / jnp.sqrt(float(fin))
        params[f"w{i}"] = jax.random.uniform(
            kw, (fin, fout), jnp.float32, minval=-bound, maxval=bound)
        params[f"b{i}"] = jax.random.uniform(
            kb, (1, fout), jnp.float32, minval=-bound, maxval=bound)
    return params


def reference_forward(x, params):
    """Plain-JAX reference for sanity checking."""
    h = x
    for i in range(1, 4):
        h = h @ params[f"w{i}"] + params[f"b{i}"]
        h = jnp.where(h > 0, h, 0.2 * h)
    h = h @ params["w4"] + params["b4"]
    return jnp.tanh(h)


if __name__ == "__main__":
    in_features = 16
    out_features = 8
    batch = 8

    key = jax.random.PRNGKey(0)
    key, kx = jax.random.split(key)
    x = jax.random.normal(kx, (batch, in_features), dtype=jnp.float32)
    params = init_params(key, in_features, out_features)
    ref = reference_forward(x, params)

    # 1) Exact f32 path (single grid step, narrow un-padded output).
    out_f32 = jax.block_until_ready(
        generator_forward(x, params, matmul_dtype=jnp.float32))
    assert out_f32.shape == (batch, out_features)
    assert jnp.allclose(out_f32, ref, atol=1e-5, rtol=1e-5), "f32 mismatch"

    # 2) Default path: bf16 matmul inputs, f32 accumulate/elementwise, f32 out.
    out_def = jax.block_until_ready(generator_forward(x, params))
    assert out_def.shape == (batch, out_features)
    assert jnp.allclose(out_def, ref, atol=5e-2, rtol=5e-2), "bf16 mismatch"

    # 3) Multi-step grid with a ragged batch (tiling + tail padding), f32 exact.
    key, kx2 = jax.random.split(key)
    x_big = jax.random.normal(kx2, (300, in_features), dtype=jnp.float32)
    out_big = jax.block_until_ready(
        generator_forward(x_big, params, block_rows=128,
                          matmul_dtype=jnp.float32))
    ref_big = reference_forward(x_big, params)
    assert out_big.shape == (300, out_features)
    assert jnp.allclose(out_big, ref_big, atol=1e-5, rtol=1e-5), "tiled mismatch"

    # 4) bf16 output stream (halves writeback bytes; tanh output in [-1,1]).
    out_bf16 = jax.block_until_ready(
        generator_forward(x, params, out_dtype=jnp.bfloat16))
    assert out_bf16.dtype == jnp.bfloat16
    assert jnp.allclose(out_bf16.astype(jnp.float32), ref,
                        atol=5e-2, rtol=5e-2), "bf16-out mismatch"

    print("KERNEL_OK")
</pallas_src>

<mosaic_0001>
module attributes {stable_mosaic.version = 11 : i64} {
  func.func @generator_kernel(%arg0: i32, %arg1: memref<8x16xf32, #tpu.memory_space<vmem>>, %arg2: memref<16x128xf32, #tpu.memory_space<vmem>>, %arg3: memref<1x128xf32, #tpu.memory_space<vmem>>, %arg4: memref<128x128xf32, #tpu.memory_space<vmem>>, %arg5: memref<1x128xf32, #tpu.memory_space<vmem>>, %arg6: memref<128x128xf32, #tpu.memory_space<vmem>>, %arg7: memref<1x128xf32, #tpu.memory_space<vmem>>, %arg8: memref<128x128xf32, #tpu.memory_space<vmem>>, %arg9: memref<1x128xf32, #tpu.memory_space<vmem>>, %arg10: memref<8x8xf32, #tpu.memory_space<vmem>>) attributes {dimension_semantics = [#tpu.dimension_semantics<parallel>], iteration_bounds = array<i64: 1>, scalar_prefetch = 0 : i64, scratch_operands = 0 : i64, tpu.core_type = #tpu.core_type<tc>, window_params = [{transform_indices = @transform_0, window_bounds = array<i64: 8, 16>}, {pipeline_mode = #tpu.pipeline_mode<synchronous>, transform_indices = @transform_1, window_bounds = array<i64: 16, 128>}, {pipeline_mode = #tpu.pipeline_mode<synchronous>, transform_indices = @transform_2, window_bounds = array<i64: 1, 128>}, {pipeline_mode = #tpu.pipeline_mode<synchronous>, transform_indices = @transform_3, window_bounds = array<i64: 128, 128>}, {pipeline_mode = #tpu.pipeline_mode<synchronous>, transform_indices = @transform_4, window_bounds = array<i64: 1, 128>}, {pipeline_mode = #tpu.pipeline_mode<synchronous>, transform_indices = @transform_5, window_bounds = array<i64: 128, 128>}, {pipeline_mode = #tpu.pipeline_mode<synchronous>, transform_indices = @transform_6, window_bounds = array<i64: 1, 128>}, {pipeline_mode = #tpu.pipeline_mode<synchronous>, transform_indices = @transform_7, window_bounds = array<i64: 128, 128>}, {pipeline_mode = #tpu.pipeline_mode<synchronous>, transform_indices = @transform_8, window_bounds = array<i64: 1, 128>}, {transform_indices = @transform_9, window_bounds = array<i64: 8, 8>}]} {
    %c0 = arith.constant 0 : index
    %c0_0 = arith.constant 0 : index
    %0 = vector.load %arg1[%c0, %c0_0] : memref<8x16xf32, #tpu.memory_space<vmem>>, vector<8x16xf32>
    %c0_1 = arith.constant 0 : index
    %c0_2 = arith.constant 0 : index
    %1 = vector.load %arg2[%c0_1, %c0_2] : memref<16x128xf32, #tpu.memory_space<vmem>>, vector<16x128xf32>
    %c0_3 = arith.constant 0 : index
    %c0_4 = arith.constant 0 : index
    %2 = vector.load %arg3[%c0_3, %c0_4] : memref<1x128xf32, #tpu.memory_space<vmem>>, vector<1x128xf32>
    %c0_5 = arith.constant 0 : index
    %c0_6 = arith.constant 0 : index
    %3 = vector.load %arg4[%c0_5, %c0_6] : memref<128x128xf32, #tpu.memory_space<vmem>>, vector<128x128xf32>
    %c0_7 = arith.constant 0 : index
    %c0_8 = arith.constant 0 : index
    %4 = vector.load %arg5[%c0_7, %c0_8] : memref<1x128xf32, #tpu.memory_space<vmem>>, vector<1x128xf32>
    %c0_9 = arith.constant 0 : index
    %c0_10 = arith.constant 0 : index
    %5 = vector.load %arg6[%c0_9, %c0_10] : memref<128x128xf32, #tpu.memory_space<vmem>>, vector<128x128xf32>
    %c0_11 = arith.constant 0 : index
    %c0_12 = arith.constant 0 : index
    %6 = vector.load %arg7[%c0_11, %c0_12] : memref<1x128xf32, #tpu.memory_space<vmem>>, vector<1x128xf32>
    %c0_13 = arith.constant 0 : index
    %c0_14 = arith.constant 0 : index
    %7 = vector.load %arg8[%c0_13, %c0_14] : memref<128x128xf32, #tpu.memory_space<vmem>>, vector<128x128xf32>
    %c0_15 = arith.constant 0 : index
    %c0_16 = arith.constant 0 : index
    %8 = vector.load %arg9[%c0_15, %c0_16] : memref<1x128xf32, #tpu.memory_space<vmem>>, vector<1x128xf32>
    %cst = arith.constant dense<0.000000e+00> : vector<8x128xf32>
    %9 = tpu.matmul %0, %1, %cst {dimension_numbers = #tpu.dot_dimension_numbers<[1], [0], [0], [1], [0, 0, 1, 1], [], []>} : vector<8x16xf32>, vector<16x128xf32>, vector<8x128xf32> -> vector<8x128xf32>
    %10 = vector.broadcast %2 : vector<1x128xf32> to vector<8x128xf32>
    %11 = arith.addf %9, %10 : vector<8x128xf32>
    %cst_17 = arith.constant 0.000000e+00 : f32
    %12 = vector.broadcast %cst_17 : f32 to vector<8x128xf32>
    %13 = arith.cmpf ogt, %11, %12 : vector<8x128xf32>
    %cst_18 = arith.constant 2.000000e-01 : f32
    %14 = vector.broadcast %cst_18 : f32 to vector<8x128xf32>
    %15 = arith.mulf %14, %11 : vector<8x128xf32>
    %16 = arith.select %13, %11, %15 : vector<8x128xi1>, vector<8x128xf32>
    %cst_19 = arith.constant dense<0.000000e+00> : vector<8x128xf32>
    %17 = tpu.matmul %16, %3, %cst_19 {dimension_numbers = #tpu.dot_dimension_numbers<[1], [0], [0], [1], [0, 0, 1, 1], [], []>} : vector<8x128xf32>, vector<128x128xf32>, vector<8x128xf32> -> vector<8x128xf32>
    %18 = vector.broadcast %4 : vector<1x128xf32> to vector<8x128xf32>
    %19 = arith.addf %17, %18 : vector<8x128xf32>
    %cst_20 = arith.constant 0.000000e+00 : f32
    %20 = vector.broadcast %cst_20 : f32 to vector<8x128xf32>
    %21 = arith.cmpf ogt, %19, %20 : vector<8x128xf32>
    %cst_21 = arith.constant 2.000000e-01 : f32
    %22 = vector.broadcast %cst_21 : f32 to vector<8x128xf32>
    %23 = arith.mulf %22, %19 : vector<8x128xf32>
    %24 = arith.select %21, %19, %23 : vector<8x128xi1>, vector<8x128xf32>
    %cst_22 = arith.constant dense<0.000000e+00> : vector<8x128xf32>
    %25 = tpu.matmul %24, %5, %cst_22 {dimension_numbers = #tpu.dot_dimension_numbers<[1], [0], [0], [1], [0, 0, 1, 1], [], []>} : vector<8x128xf32>, vector<128x128xf32>, vector<8x128xf32> -> vector<8x128xf32>
    %26 = vector.broadcast %6 : vector<1x128xf32> to vector<8x128xf32>
    %27 = arith.addf %25, %26 : vector<8x128xf32>
    %cst_23 = arith.constant 0.000000e+00 : f32
    %28 = vector.broadcast %cst_23 : f32 to vector<8x128xf32>
    %29 = arith.cmpf ogt, %27, %28 : vector<8x128xf32>
    %cst_24 = arith.constant 2.000000e-01 : f32
    %30 = vector.broadcast %cst_24 : f32 to vector<8x128xf32>
    %31 = arith.mulf %30, %27 : vector<8x128xf32>
    %32 = arith.select %29, %27, %31 : vector<8x128xi1>, vector<8x128xf32>
    %cst_25 = arith.constant dense<0.000000e+00> : vector<8x128xf32>
    %33 = tpu.matmul %32, %7, %cst_25 {dimension_numbers = #tpu.dot_dimension_numbers<[1], [0], [0], [1], [0, 0, 1, 1], [], []>} : vector<8x128xf32>, vector<128x128xf32>, vector<8x128xf32> -> vector<8x128xf32>
    %34 = vector.broadcast %8 : vector<1x128xf32> to vector<8x128xf32>
    %35 = arith.addf %33, %34 : vector<8x128xf32>
    %36 = vector.extract_strided_slice %35 {offsets = [0, 0], sizes = [8, 8], strides = [1, 1]} : vector<8x128xf32> to vector<8x8xf32>
    %37 = math.tanh %36 : vector<8x8xf32>
    %c0_26 = arith.constant 0 : index
    %c0_27 = arith.constant 0 : index
    %38 = vector.load %arg10[%c0_26, %c0_27] : memref<8x8xf32, #tpu.memory_space<vmem>>, vector<8x8xf32>
    tpu.vector_store %arg10[%c0_26, %c0_27], %37 {strides = array<i32>} : memref<8x8xf32, #tpu.memory_space<vmem>>, vector<8x8xf32>,
    return
  }
  func.func @transform_0(%arg0: i32) -> (i32, i32) {
    %c0_i32 = arith.constant 0 : i32
    %c0_i32_0 = arith.constant 0 : i32
    return %arg0, %c0_i32 : i32, i32
  }
  func.func @transform_1(%arg0: i32) -> (i32, i32) {
    %c0_i32 = arith.constant 0 : i32
    %c0_i32_0 = arith.constant 0 : i32
    %c0_i32_1 = arith.constant 0 : i32
    return %c0_i32, %c0_i32_0 : i32, i32
  }
  func.func @transform_2(%arg0: i32) -> (i32, i32) {
    %c0_i32 = arith.constant 0 : i32
    %c0_i32_0 = arith.constant 0 : i32
    %c0_i32_1 = arith.constant 0 : i32
    return %c0_i32, %c0_i32_0 : i32, i32
  }
  func.func @transform_3(%arg0: i32) -> (i32, i32) {
    %c0_i32 = arith.constant 0 : i32
    %c0_i32_0 = arith.constant 0 : i32
    %c0_i32_1 = arith.constant 0 : i32
    return %c0_i32, %c0_i32_0 : i32, i32
  }
  func.func @transform_4(%arg0: i32) -> (i32, i32) {
    %c0_i32 = arith.constant 0 : i32
    %c0_i32_0 = arith.constant 0 : i32
    %c0_i32_1 = arith.constant 0 : i32
    return %c0_i32, %c0_i32_0 : i32, i32
  }
  func.func @transform_5(%arg0: i32) -> (i32, i32) {
    %c0_i32 = arith.constant 0 : i32
    %c0_i32_0 = arith.constant 0 : i32
    %c0_i32_1 = arith.constant 0 : i32
    return %c0_i32, %c0_i32_0 : i32, i32
  }
  func.func @transform_6(%arg0: i32) -> (i32, i32) {
    %c0_i32 = arith.constant 0 : i32
    %c0_i32_0 = arith.constant 0 : i32
    %c0_i32_1 = arith.constant 0 : i32
    return %c0_i32, %c0_i32_0 : i32, i32
  }
  func.func @transform_7(%arg0: i32) -> (i32, i32) {
    %c0_i32 = arith.constant 0 : i32
    %c0_i32_0 = arith.constant 0 : i32
    %c0_i32_1 = arith.constant 0 : i32
    return %c0_i32, %c0_i32_0 : i32, i32
  }
  func.func @transform_8(%arg0: i32) -> (i32, i32) {
    %c0_i32 = arith.constant 0 : i32
    %c0_i32_0 = arith.constant 0 : i32
    %c0_i32_1 = arith.constant 0 : i32
    return %c0_i32, %c0_i32_0 : i32, i32
  }
  func.func @transform_9(%arg0: i32) -> (i32, i32) {
    %c0_i32 = arith.constant 0 : i32
    %c0_i32_0 = arith.constant 0 : i32
    return %arg0, %c0_i32 : i32, i32
  }
}

</mosaic_0001>

<bundles_post_ra>
// kernel: tpu_custom_call.1
= control target key start
LH: loop header
LB: loop body
LE: loop exit
PB: predicated region body
PF: predicated region fallthrough
CT: control target
= control target key end

     0   :  { %14 = vsyncpa [#allocation3], 0  ;;  %s546_s0 = inlined_call_operand.hbm [shape: f32[8,16], index: 0, kind: input, shape index: {}]   ;;  %s547_s1 = inlined_call_operand.hbm [shape: f32[16,128], index: 1, kind: input, shape index: {}]   ;;  %s548_s2 = inlined_call_operand.vmem [shape: f32[1,128], index: 2, kind: input, shape index: {}]   ;;  %s549_s3 = inlined_call_operand.hbm [shape: f32[128,128], index: 3, kind: input, shape index: {}]   ;;  %s550_s4 = inlined_call_operand.vmem [shape: f32[1,128], index: 4, kind: input, shape index: {}]   ;;  %s551_s5 = inlined_call_operand.hbm [shape: f32[128,128], index: 5, kind: input, shape index: {}]   ;;  %s552_s6 = inlined_call_operand.vmem [shape: f32[1,128], index: 6, kind: input, shape index: {}]   ;;  %s553_s7 = inlined_call_operand.hbm [shape: f32[128,128], index: 7, kind: input, shape index: {}]   ;;  %s554_s8 = inlined_call_operand.vmem [shape: f32[1,128], index: 8, kind: input, shape index: {}]   ;;  %s555_s9 = inlined_call_operand.hbm [shape: f32[8,8], index: 9, kind: output, shape index: {}]  }
   0x1   :  { %15 = vsyncpa [#allocation6], 0 }
   0x2   :  { %16 = vsyncpa [#allocation9], 0  ;;  %s33_s11 = sshll.u32 %s547_s1, 4  ;;  %s34_s11 = int_to_ptr.hbm [resolvable:$true] %s33_s11 }
   0x3   :  { %17 = vsyncpa [#allocation4], 0  ;;  %s458_s12 = smov [#allocation5]   ;;  %s63_s16 = sshll.u32 %s551_s5, 4  ;;  %s64_s16 = int_to_ptr.hbm [resolvable:$true] %s63_s16 }
   0x4   :  { %s35_s13 = sshll.u32 %s458_s12, 4  ;;  %s459_s17 = smov 128   ;;  %s36_s13 = int_to_ptr.vmem [resolvable:$true] %s35_s13 }
   0x5   :  { %s460_s18 = smov 8   ;;  %s461_s19 = smov [#allocation8]  }
   0x6   :  { %41 = dma.hbm_to_vmem [thread:$0]  %s34_s11, 256, %s36_s13, [#allocation6], %s459_s17, %s459_s17, %s460_s18  }
   0x7   :  { %s65_s20 = sshll.u32 %s461_s19, 4  ;;  %s23_s23 = sshll.u32 %s546_s0, 4  ;;  %s66_s20 = int_to_ptr.vmem [resolvable:$true] %s65_s20  ;;  %s24_s23 = int_to_ptr.hbm [resolvable:$true] %s23_s23 }
   0x8   :  { %71 = dma.hbm_to_vmem [thread:$0]  %s64_s16, 2048, %s66_s20, [#allocation9], %s459_s17, %s459_s17, %s460_s18  }
   0x9   :  { %s48_s25 = sshll.u32 %s549_s3, 4  ;;  %s462_s26 = smov [#allocation2]   ;;  %s49_s25 = int_to_ptr.hbm [resolvable:$true] %s48_s25 }
   0xa   :  { %s25_s27 = sshll.u32 %s462_s26, 4  ;;  %s463_s5 = smov [#allocation7]   ;;  %s26_s27 = int_to_ptr.vmem [resolvable:$true] %s25_s27 }
   0xb   :  { %28 = dma.hbm_to_vmem [thread:$0]  %s24_s23, 128, %s26_s27, [#allocation3]  }
   0xc   :  { %s50_s28 = sshll.u32 %s463_s5, 4  ;;  %s78_s10 = sshll.u32 %s553_s7, 4  ;;  %s51_s28 = int_to_ptr.vmem [resolvable:$true] %s50_s28  ;;  %s79_s10 = int_to_ptr.hbm [resolvable:$true] %s78_s10 }
   0xd   :  { %56 = dma.hbm_to_vmem [thread:$0]  %s49_s25, 2048, %s51_s28, [#allocation6], %s459_s17, %s459_s17, %s460_s18  }
   0xe   :  { %s464_s0 = smov [#allocation10]  }
   0xf   :  { %s80_s11 = sshll.u32 %s464_s0, 4  ;;  %s81_s11 = int_to_ptr.vmem [resolvable:$true] %s80_s11 }
  0x10   :  { %86 = dma.hbm_to_vmem [thread:$0]  %s79_s10, 2048, %s81_s11, [#allocation9], %s459_s17, %s459_s17, %s460_s18  }
  0x11   :  { %450 = dma.done.wait [#allocation3], 128  }
  0x12   :  { %451 = vsyncadd [#allocation3], 4294967168 }
  0x13   :  { %452 = dma.done.wait [#allocation6], 2304  }
  0x14   :  { %453 = vsyncadd [#allocation6], 4294964992 }
  0x15   :  { %454 = dma.done.wait [#allocation9], 4096  }
  0x16   :  { %455 = vsyncadd [#allocation9], 4294963200  ;;  %v111_v0 = vld [vmem:[#allocation5 + $0x8] sm:$0xff]  ;;  %v110_v1 = vld [vmem:[#allocation5] sm:$0xff]  ;;  %vm167_vm0 = vcmask 130048   ;;  %s465_s16 = smov [#allocation11]  }
  0x17   :  { %185 = vmatpush.msra.mxu0 %v111_v0  ;;  %v109_v2 = vld [vmem:[#allocation2] sm:$0xff]  ;;  %v128_v3 = vld [vmem:[#allocation7 + $0x78] sm:$0xff]  ;;  %v127_v4 = vld [vmem:[#allocation7 + $0x70] sm:$0xff]  ;;  %s277_s17 = sshll.u32 %s465_s16, 4  ;;  %s279_s20 = sshll.u32 %s555_s9, 4  ;;  %vm270_vm4 = vcmask 64512   ;;  %s278_s17 = int_to_ptr.vmem [resolvable:$true] %s277_s17  ;;  %s280_s20 = int_to_ptr.hbm [resolvable:$true] %s279_s20 }
  0x18   :  { %197 = vmatpush.msra.mxu1 %v128_v3  ;;  %v126_v5 = vld [vmem:[#allocation7 + $0x68] sm:$0xff]  ;;  %v125_v6 = vld [vmem:[#allocation7 + $0x60] sm:$0xff]  ;;  %v124_v7 = vld [vmem:[#allocation7 + $0x58] sm:$0xff] }
  0x19   :  { %186 = vmatpush.msra.mxu0 %v110_v1  ;;  %v123_v8 = vld [vmem:[#allocation7 + $0x50] sm:$0xff]  ;;  %v122_v9 = vld [vmem:[#allocation7 + $0x48] sm:$0xff]  ;;  %v121_v10 = vld [vmem:[#allocation7 + $0x40] sm:$0xff] }
  0x1a   :  { %291 = vmatmul.msk.f32.vlgmr.msra.gmra.mxu0 %vm167_vm0, %v109_v2  ;;  %198 = vmatpush.msra.mxu1 %v127_v4  ;;  %v120_v11 = vld [vmem:[#allocation7 + $0x38] sm:$0xff]  ;;  %v119_v12 = vld [vmem:[#allocation7 + $0x30] sm:$0xff]  ;;  %v118_v13 = vld [vmem:[#allocation7 + $0x28] sm:$0xff] }
  0x1b   :  { %v117_v14 = vld [vmem:[#allocation7 + $0x20] sm:$0xff]  ;;  %v116_v15 = vld [vmem:[#allocation7 + $0x18] sm:$0xff]  ;;  %v115_v16 = vld [vmem:[#allocation7 + $0x10] sm:$0xff] }
  0x1c   :  { %199 = vmatpush.msra.mxu1 %v126_v5  ;;  %v114_v17 = vld [vmem:[#allocation7 + $0x8] sm:$0xff]  ;;  %v113_v18 = vld [vmem:[#allocation7] sm:$0xff]  ;;  %v145_v19 = vld [vmem:[#allocation8 + $0x78] sm:$0xff] }
  0x1d   :  { %v144_v20 = vld [vmem:[#allocation8 + $0x70] sm:$0xff]  ;;  %223 = vmatpush.msra.mxu2 %v145_v19  ;;  %v143_v21 = vld [vmem:[#allocation8 + $0x68] sm:$0xff]  ;;  %v142_v22 = vld [vmem:[#allocation8 + $0x60] sm:$0xff] }
  0x1e   :  { %200 = vmatpush.msra.mxu1 %v125_v6  ;;  %v141_v23 = vld [vmem:[#allocation8 + $0x58] sm:$0xff]  ;;  %v140_v24 = vld [vmem:[#allocation8 + $0x50] sm:$0xff]  ;;  %v139_v25 = vld [vmem:[#allocation8 + $0x48] sm:$0xff] }
  0x1f   :  { %224 = vmatpush.msra.mxu2 %v144_v20  ;;  %v138_v26 = vld [vmem:[#allocation8 + $0x40] sm:$0xff]  ;;  %v137_v27 = vld [vmem:[#allocation8 + $0x38] sm:$0xff]  ;;  %v136_v28 = vld [vmem:[#allocation8 + $0x30] sm:$0xff] }
  0x20   :  { %201 = vmatpush.msra.mxu1 %v124_v7  ;;  %v135_v29 = vld [vmem:[#allocation8 + $0x28] sm:$0xff]  ;;  %v134_v30 = vld [vmem:[#allocation8 + $0x20] sm:$0xff]  ;;  %v133_v31 = vld [vmem:[#allocation8 + $0x18] sm:$0xff] }
  0x21   :  { %225 = vmatpush.msra.mxu2 %v143_v21  ;;  %v300_v32 = vld [vmem:[%s548_s2] ss:$0 sm:$0xff]  ;;  %v132_v37 = vld [vmem:[#allocation8 + $0x10] sm:$0xff]  ;;  %v130_v39 = vld [vmem:[#allocation8] sm:$0xff] }
  0x22   :  { %202 = vmatpush.msra.mxu1 %v123_v8  ;;  %v131_v38 = vld [vmem:[#allocation8 + $0x8] sm:$0xff]  ;;  %v162_v40 = vld [vmem:[#allocation10 + $0x78] sm:$0xff]  ;;  %v161_v41 = vld [vmem:[#allocation10 + $0x70] sm:$0xff] }
  0x23   :  { %226 = vmatpush.msra.mxu2 %v142_v22  ;;  %249 = vmatpush.msra.mxu3 %v162_v40  ;;  %v160_v42 = vld [vmem:[#allocation10 + $0x68] sm:$0xff]  ;;  %v159_v43 = vld [vmem:[#allocation10 + $0x60] sm:$0xff]  ;;  %v158_v44 = vld [vmem:[#allocation10 + $0x58] sm:$0xff] }
  0x24   :  { %203 = vmatpush.msra.mxu1 %v122_v9  ;;  %v157_v45 = vld [vmem:[#allocation10 + $0x50] sm:$0xff]  ;;  %v156_v46 = vld [vmem:[#allocation10 + $0x48] sm:$0xff]  ;;  %v155_v47 = vld [vmem:[#allocation10 + $0x40] sm:$0xff] }
  0x25   :  { %227 = vmatpush.msra.mxu2 %v141_v23  ;;  %250 = vmatpush.msra.mxu3 %v161_v41  ;;  %v154_v48 = vld [vmem:[#allocation10 + $0x38] sm:$0xff]  ;;  %v153_v49 = vld [vmem:[#allocation10 + $0x30] sm:$0xff]  ;;  %v152_v50 = vld [vmem:[#allocation10 + $0x28] sm:$0xff] }
  0x26   :  { %204 = vmatpush.msra.mxu1 %v121_v10  ;;  %v151_v51 = vld [vmem:[#allocation10 + $0x20] sm:$0xff]  ;;  %v150_v52 = vld [vmem:[#allocation10 + $0x18] sm:$0xff]  ;;  %v301_v53 = vld [vmem:[%s550_s4] ss:$0 sm:$0xff] }
  0x27   :  { %228 = vmatpush.msra.mxu2 %v140_v24  ;;  %251 = vmatpush.msra.mxu3 %v160_v42  ;;  %v149_v58 = vld [vmem:[#allocation10 + $0x10] sm:$0xff]  ;;  %v148_v59 = vld [vmem:[#allocation10 + $0x8] sm:$0xff]  ;;  %v147_v60 = vld [vmem:[#allocation10] sm:$0xff] }
  0x28   :  { %205 = vmatpush.msra.mxu1 %v120_v11  ;;  %v302_v61 = vld [vmem:[%s552_s6] ss:$0 sm:$0xff] }
  0x29   :  { %229 = vmatpush.msra.mxu2 %v139_v25  ;;  %252 = vmatpush.msra.mxu3 %v159_v43  ;;  %v303_v2 = vld [vmem:[%s554_s8] ss:$0 sm:$0xff] }
  0x2a   :  { %206 = vmatpush.msra.mxu1 %v119_v12 }
  0x2b   :  { %230 = vmatpush.msra.mxu2 %v138_v26  ;;  %253 = vmatpush.msra.mxu3 %v158_v44 }
  0x2c   :  { %207 = vmatpush.msra.mxu1 %v118_v13 }
  0x2d   :  { %231 = vmatpush.msra.mxu2 %v137_v27  ;;  %254 = vmatpush.msra.mxu3 %v157_v45 }
  0x2e   :  { %208 = vmatpush.msra.mxu1 %v117_v14 }
  0x2f   :  { %232 = vmatpush.msra.mxu2 %v136_v28  ;;  %255 = vmatpush.msra.mxu3 %v156_v46 }
  0x30   :  { %209 = vmatpush.msra.mxu1 %v116_v15 }
  0x31   :  { %233 = vmatpush.msra.mxu2 %v135_v29  ;;  %256 = vmatpush.msra.mxu3 %v155_v47 }
  0x32   :  { %210 = vmatpush.msra.mxu1 %v115_v16 }
  0x33   :  { %234 = vmatpush.msra.mxu2 %v134_v30  ;;  %257 = vmatpush.msra.mxu3 %v154_v48 }
  0x34   :  { %211 = vmatpush.msra.mxu1 %v114_v17 }
  0x35   :  { %235 = vmatpush.msra.mxu2 %v133_v31  ;;  %258 = vmatpush.msra.mxu3 %v153_v49 }
  0x36   :  { %212 = vmatpush.msra.mxu1 %v113_v18 }
  0x37   :  { %236 = vmatpush.msra.mxu2 %v132_v37  ;;  %259 = vmatpush.msra.mxu3 %v152_v50 }
  0x39   :  { %237 = vmatpush.msra.mxu2 %v131_v38  ;;  %260 = vmatpush.msra.mxu3 %v151_v51 }
  0x3b   :  { %238 = vmatpush.msra.mxu2 %v130_v39  ;;  %261 = vmatpush.msra.mxu3 %v150_v52 }
  0x3d   :  { %262 = vmatpush.msra.mxu3 %v149_v58 }
  0x3f   :  { %263 = vmatpush.msra.mxu3 %v148_v59 }
  0x41   :  { %264 = vmatpush.msra.mxu3 %v147_v60 }
  0x97   :  { %v188_v33 = vpop.f32.mrf.mxu0 }
  0x98   :  { %v189_v34 = vadd.f32 %v300_v32, %v188_v33 }
  0x9a   :  { %vm191_vm1 = vcmp.gt.f32.partialorder %v189_v34, 0.0  ;;  %v192_v35 = vmul.f32 0.2, %v189_v34 }
  0x9c   :  { %v193_v36 = vsel %vm191_vm1, %v189_v34, %v192_v35 }
  0x9d   :  { %213 = vmatmul.f32.vlgmr.msra.gmra.mxu1 %v193_v36 }
 0x11a   :  { %v214_v54 = vpop.f32.mrf.mxu1 }
 0x11b   :  { %v215_v55 = vadd.f32 %v301_v53, %v214_v54 }
 0x11d   :  { %vm217_vm2 = vcmp.gt.f32.partialorder %v215_v55, 0.0  ;;  %v218_v56 = vmul.f32 0.2, %v215_v55 }
 0x11f   :  { %v219_v57 = vsel %vm217_vm2, %v215_v55, %v218_v56 }
 0x120   :  { %239 = vmatmul.f32.vlgmr.msra.gmra.mxu2 %v219_v57 }
 0x1a3   :  { %v240_v62 = vpop.f32.mrf.mxu2 }
 0x1a4   :  { %v241_v63 = vadd.f32 %v302_v61, %v240_v62 }
 0x1a6   :  { %vm243_vm3 = vcmp.gt.f32.partialorder %v241_v63, 0.0  ;;  %v244_v0 = vmul.f32 0.2, %v241_v63 }
 0x1a8   :  { %v245_v1 = vsel %vm243_vm3, %v241_v63, %v244_v0 }
 0x1a9   :  { %265 = vmatmul.f32.vlgmr.msra.gmra.mxu3 %v245_v1 }
 0x22c   :  { %v266_v3 = vpop.f32.mrf.mxu3 }
 0x22d   :  { %v267_v4 = vadd.f32 %v303_v2, %v266_v3 }
 0x22f   :  { %304 = vtanh.f32 %v267_v4 }
 0x235   :  { %v305_v5 = vpop.eup %304 }
 0x236   :  { %271 = vst.msk [vmem:[#allocation11] sm:$0xff] %vm270_vm4, %v305_v5 }
 0x237   :  { %282 = dma.vmem_to_hbm [thread:$0]  %s278_s17, 128, %s280_s20, [#allocation4]  }
 0x238   :  { %456 = dma.done.wait [#allocation4], 128  }
 0x239   :  { %457 = vsyncadd [#allocation4], 4294967168 }
 0x23a   :  { %287 = vsyncpa [#allocation3], 1 }
 0x23b   :  { %288 = vsyncpa [#allocation6], 1 }
 0x23c   :  { %289 = vsyncpa [#allocation9], 1 }
 0x23d   :  { %290 = vsyncpa [#allocation4], 1 }

</bundles_post_ra>
